<compile_context>
chip_gen: v7x
topology: tpu7x:2x2x1
jax: 0.10.0
libtpu: 0.0.40
codegen_flags: <defaults>
</compile_context>

<pallas_src>
import functools

import jax
import jax.numpy as jnp
from jax.experimental import pallas as pl
from jax.experimental.pallas import tpu as pltpu

_LOG_CLAMP = -100.0   # torch BCELoss clamps log terms at -100
_LANES = 128
_SLAB = 128           # rows per inner reduction slab (multiple of 8)


def _round_up(x, m):
    return -(-x // m) * m


def _tensorcores_per_chip():
    """2 on v7x (2 TCs/chip); 1 on v5e/v6e (and anything unrecognised)."""
    try:
        kind = jax.devices()[0].device_kind.lower()
    except Exception:
        return 1
    return 2 if "7" in kind else 1


def _area_loss_kernel(r0_ref, r1_ref, r2_ref, r3_ref, out_ref, *, n_slabs, slab):
    """Accumulates weighted (negative) BCE sums into a (1, 8, 128) resident block."""
    i = pl.program_id(1)

    @pl.when(i == 0)
    def _():
        out_ref[...] = jnp.zeros_like(out_ref)

    def slab_partial(j, acc):
        row = pl.multiple_of(j * slab, slab)
        sl = pl.ds(row, slab)
        y = r0_ref[sl, :].astype(jnp.float32)        # target (recons[0]) slab
        one_minus_y = 1.0 - y                        # hoisted: shared by all 3 preds

        def weighted_bce_sum(x_ref, w):
            x = x_ref[sl, :].astype(jnp.float32)     # prediction slab
            log_x = jnp.maximum(jnp.log(x), _LOG_CLAMP)
            log_1mx = jnp.maximum(jnp.log1p(-x), _LOG_CLAMP)
            return w * (y * log_x + one_minus_y * log_1mx)   # <= 0; sign applied in wrapper

        s = (weighted_bce_sum(r1_ref, 1.0)
             + weighted_bce_sum(r2_ref, 0.5)
             + weighted_bce_sum(r3_ref, 0.25))
        # VPU-only fold: (slab, 128) -> (8, 128) via vreg adds (no cross-lane XLU work).
        return acc + jnp.sum(s.reshape(-1, 8, 128), axis=0)

    acc = jax.lax.fori_loop(0, n_slabs, slab_partial,
                            jnp.zeros((8, _LANES), jnp.float32),
                            unroll=min(n_slabs, 4))
    out_ref[...] += acc[None, :, :]


def _call_area_kernel(flats, *, n_splits, inner_tiles, rt, slab, lead_sem, cost):
    kernel = functools.partial(_area_loss_kernel, n_slabs=rt // slab, slab=slab)
    recon_spec = pl.BlockSpec((rt, _LANES), lambda c, i: (c * inner_tiles + i, 0))
    return pl.pallas_call(
        kernel,
        out_shape=jax.ShapeDtypeStruct((n_splits, 8, _LANES), jnp.float32),
        grid_spec=pltpu.PrefetchScalarGridSpec(
            num_scalar_prefetch=0,
            grid=(n_splits, inner_tiles),
            in_specs=[recon_spec, recon_spec, recon_spec, recon_spec],
            out_specs=pl.BlockSpec((1, 8, _LANES), lambda c, i: (c, 0, 0)),
        ),
        compiler_params=pltpu.CompilerParams(
            dimension_semantics=(lead_sem, "arbitrary"),
            vmem_limit_bytes=32 * 1024 * 1024),
        cost_estimate=cost,
    )(*flats)


def hourglass_loss(recons, heights, *, row_tile=4096, min_pallas_elements=1 << 20):
    """recons: list of 4 arrays, same shape; heights: [h0 (N,), h1 (N, 1)]."""
    r0, r1, r2, r3 = recons
    h0, h1 = heights
    total = r0.size

    # L1 height loss: O(N) work, plain JAX (broadcasts like torch L1Loss).
    h0_col = h0.reshape(-1, 1).astype(jnp.float32)
    h_loss = jnp.mean(jnp.abs(h1.astype(jnp.float32) - h0_col))

    # Tiny tensors: fixed pallas_call cost dominates -> plain XLA fusion is faster.
    if total < min_pallas_elements:
        return _area_loss_jax(recons) + 0.01 * h_loss

    rows = -(-total // _LANES)

    # Leading grid axis = one block per TensorCore (only where there are 2 TCs).
    tc = _tensorcores_per_chip()
    n_splits = tc if (tc > 1 and rows >= 8 * tc) else 1
    rows_per_split = -(-rows // n_splits)

    # Tile size: largest <= row_tile; pad rows instead of searching for exact divisors.
    rt = min(row_tile, _round_up(rows_per_split, 8))
    if rt >= _SLAB:
        rt = _round_up(rt, _SLAB)
        slab = _SLAB
    else:
        slab = rt                      # already a multiple of 8
    inner_tiles = -(-rows_per_split // rt)
    padded_rows = n_splits * inner_tiles * rt
    padded_total = padded_rows * _LANES

    def flat(x):
        x = x.reshape(-1)
        pad = padded_total - total
        if pad:
            # x = y = 1 contributes exactly 0 to the BCE sum (log terms clamped).
            x = jnp.pad(x, (0, pad), constant_values=1)
        return x.reshape(padded_rows, _LANES)

    flats = (flat(r0), flat(r1), flat(r2), flat(r3))

    itemsize = jnp.dtype(r0.dtype).itemsize
    cost = pl.CostEstimate(flops=30 * padded_total,
                           transcendentals=6 * padded_total,
                           bytes_accessed=4 * itemsize * padded_total)

    # Prefer CORE_PARALLEL on 2-TC chips so both TensorCores are actually used;
    # fall back to plain "parallel" if the runtime rejects it.
    if n_splits > 1:
        lead_sems = (pltpu.CORE_PARALLEL, "parallel")
    else:
        lead_sems = ("arbitrary",)

    partials, err = None, None
    for lead_sem in lead_sems:
        try:
            partials = _call_area_kernel(flats, n_splits=n_splits,
                                         inner_tiles=inner_tiles, rt=rt, slab=slab,
                                         lead_sem=lead_sem, cost=cost)
            break
        except Exception as e:   # pragma: no cover - CORE_PARALLEL fallback
            err = e
    if partials is None:
        raise err

    # Final cross-lane reduce, negate and mean-scale in XLA (tiny).
    area_loss = -jnp.sum(partials) / jnp.float32(total)
    return area_loss + 0.01 * h_loss


def _bce_jax(x, y):
    x = x.astype(jnp.float32)
    log_x = jnp.maximum(jnp.log(x), _LOG_CLAMP)
    log_1mx = jnp.maximum(jnp.log1p(-x), _LOG_CLAMP)
    return jnp.mean(-(y * log_x + (1.0 - y) * log_1mx))


def _area_loss_jax(recons):
    y = recons[0].astype(jnp.float32)
    return (_bce_jax(recons[1], y)
            + _bce_jax(recons[2], y) / 2
            + _bce_jax(recons[3], y) / 4)


def hourglass_loss_ref(recons, heights):
    """Pure-JAX reference matching torch semantics."""
    area = _area_loss_jax(recons)
    h0 = heights[0].reshape(-1, 1).astype(jnp.float32)
    h1 = heights[1].astype(jnp.float32)
    return area + 0.01 * jnp.mean(jnp.abs(h1 - h0))


if __name__ == "__main__":
    key = jax.random.PRNGKey(0)
    kr0, kr1, kr2, kr3, kh0, kh1 = jax.random.split(key, 6)

    B, C, H, W = 2, 4, 16, 16   # NCHW, total elems = 2048 = 16 rows x 128 lanes
    N = 8                       # batch for heights

    # BCE requires values in (0, 1): use sigmoid of random normals.
    recons = [
        jax.nn.sigmoid(jax.random.normal(k, (B, C, H, W), dtype=jnp.float32))
        for k in (kr0, kr1, kr2, kr3)
    ]
    heights = [
        jax.random.normal(kh0, (N,), dtype=jnp.float32),
        jax.random.normal(kh1, (N, 1), dtype=jnp.float32),
    ]

    # Force the Pallas path even at demo size (min_pallas_elements=0).
    out = jax.block_until_ready(
        hourglass_loss(recons, heights, min_pallas_elements=0))
    ref = jax.block_until_ready(hourglass_loss_ref(recons, heights))

    assert jnp.allclose(out, ref, rtol=1e-5, atol=1e-5), (out, ref)
    print("KERNEL_OK")
</pallas_src>

<mosaic_0001>
module attributes {stable_mosaic.version = 11 : i64} {
  func.func @_area_loss_kernel(%arg0: i32, %arg1: i32, %arg2: memref<16x128xf32, #tpu.memory_space<vmem>>, %arg3: memref<16x128xf32, #tpu.memory_space<vmem>>, %arg4: memref<16x128xf32, #tpu.memory_space<vmem>>, %arg5: memref<16x128xf32, #tpu.memory_space<vmem>>, %arg6: memref<1x8x128xf32, #tpu.memory_space<vmem>>) attributes {dimension_semantics = [#tpu.dimension_semantics<arbitrary>, #tpu.dimension_semantics<arbitrary>], iteration_bounds = array<i64: 1, 1>, scalar_prefetch = 0 : i64, scratch_operands = 0 : i64, tpu.core_type = #tpu.core_type<tc>, window_params = [{transform_indices = @transform_0, window_bounds = array<i64: 16, 128>}, {transform_indices = @transform_1, window_bounds = array<i64: 16, 128>}, {transform_indices = @transform_2, window_bounds = array<i64: 16, 128>}, {transform_indices = @transform_3, window_bounds = array<i64: 16, 128>}, {transform_indices = @transform_4, window_bounds = array<i64: 1, 8, 128>}]} {
    %c0_i32 = arith.constant 0 : i32
    %0 = arith.cmpi eq, %arg1, %c0_i32 : i32
    %1 = arith.extui %0 : i1 to i32
    %c0_i32_0 = arith.constant 0 : i32
    %2 = arith.cmpi ne, %1, %c0_i32_0 : i32
    scf.if %2 {
      %cst_25 = arith.constant 0.000000e+00 : f32
      %64 = vector.broadcast %cst_25 : f32 to vector<1x8x128xf32>
      %c0_26 = arith.constant 0 : index
      %c0_27 = arith.constant 0 : index
      %c0_28 = arith.constant 0 : index
      %65 = vector.load %arg6[%c0_26, %c0_27, %c0_28] : memref<1x8x128xf32, #tpu.memory_space<vmem>>, vector<1x8x128xf32>
      tpu.vector_store %arg6[%c0_26, %c0_27, %c0_28], %64 {strides = array<i32>} : memref<1x8x128xf32, #tpu.memory_space<vmem>>, vector<1x8x128xf32>,
    } else {
    }
    %cst = arith.constant 0.000000e+00 : f32
    %3 = vector.broadcast %cst : f32 to vector<8x128xf32>
    %c0_i32_1 = arith.constant 0 : i32
    %c16_i32 = arith.constant 16 : i32
    %4 = arith.muli %c0_i32_1, %c16_i32 : i32
    %5 = tpu.assume_multiple %4, 16 : i32
    %6 = arith.index_cast %5 : i32 to index
    %c0 = arith.constant 0 : index
    %7 = vector.load %arg2[%6, %c0] : memref<16x128xf32, #tpu.memory_space<vmem>>, vector<16x128xf32>
    %cst_2 = arith.constant 1.000000e+00 : f32
    %8 = vector.broadcast %cst_2 : f32 to vector<16x128xf32>
    %9 = arith.subf %8, %7 : vector<16x128xf32>
    %10 = arith.index_cast %5 : i32 to index
    %c0_3 = arith.constant 0 : index
    %11 = vector.load %arg3[%10, %c0_3] : memref<16x128xf32, #tpu.memory_space<vmem>>, vector<16x128xf32>
    %12 = math.log %11 : vector<16x128xf32>
    %cst_4 = arith.constant -1.000000e+02 : f32
    %13 = vector.broadcast %cst_4 : f32 to vector<16x128xf32>
    %14 = arith.maximumf %12, %13 : vector<16x128xf32>
    %cst_5 = arith.constant 0.000000e+00 : f32
    %15 = vector.broadcast %cst_5 : f32 to vector<16x128xf32>
    %16 = arith.subf %15, %11 : vector<16x128xf32>
    %17 = math.log1p %16 : vector<16x128xf32>
    %cst_6 = arith.constant -1.000000e+02 : f32
    %18 = vector.broadcast %cst_6 : f32 to vector<16x128xf32>
    %19 = arith.maximumf %17, %18 : vector<16x128xf32>
    %20 = arith.mulf %7, %14 : vector<16x128xf32>
    %21 = arith.mulf %9, %19 : vector<16x128xf32>
    %22 = arith.addf %20, %21 : vector<16x128xf32>
    %cst_7 = arith.constant 1.000000e+00 : f32
    %23 = vector.broadcast %cst_7 : f32 to vector<16x128xf32>
    %24 = arith.mulf %23, %22 : vector<16x128xf32>
    %25 = arith.index_cast %5 : i32 to index
    %c0_8 = arith.constant 0 : index
    %26 = vector.load %arg4[%25, %c0_8] : memref<16x128xf32, #tpu.memory_space<vmem>>, vector<16x128xf32>
    %27 = math.log %26 : vector<16x128xf32>
    %cst_9 = arith.constant -1.000000e+02 : f32
    %28 = vector.broadcast %cst_9 : f32 to vector<16x128xf32>
    %29 = arith.maximumf %27, %28 : vector<16x128xf32>
    %cst_10 = arith.constant 0.000000e+00 : f32
    %30 = vector.broadcast %cst_10 : f32 to vector<16x128xf32>
    %31 = arith.subf %30, %26 : vector<16x128xf32>
    %32 = math.log1p %31 : vector<16x128xf32>
    %cst_11 = arith.constant -1.000000e+02 : f32
    %33 = vector.broadcast %cst_11 : f32 to vector<16x128xf32>
    %34 = arith.maximumf %32, %33 : vector<16x128xf32>
    %35 = arith.mulf %7, %29 : vector<16x128xf32>
    %36 = arith.mulf %9, %34 : vector<16x128xf32>
    %37 = arith.addf %35, %36 : vector<16x128xf32>
    %cst_12 = arith.constant 5.000000e-01 : f32
    %38 = vector.broadcast %cst_12 : f32 to vector<16x128xf32>
    %39 = arith.mulf %38, %37 : vector<16x128xf32>
    %40 = arith.addf %24, %39 : vector<16x128xf32>
    %41 = arith.index_cast %5 : i32 to index
    %c0_13 = arith.constant 0 : index
    %42 = vector.load %arg5[%41, %c0_13] : memref<16x128xf32, #tpu.memory_space<vmem>>, vector<16x128xf32>
    %43 = math.log %42 : vector<16x128xf32>
    %cst_14 = arith.constant -1.000000e+02 : f32
    %44 = vector.broadcast %cst_14 : f32 to vector<16x128xf32>
    %45 = arith.maximumf %43, %44 : vector<16x128xf32>
    %cst_15 = arith.constant 0.000000e+00 : f32
    %46 = vector.broadcast %cst_15 : f32 to vector<16x128xf32>
    %47 = arith.subf %46, %42 : vector<16x128xf32>
    %48 = math.log1p %47 : vector<16x128xf32>
    %cst_16 = arith.constant -1.000000e+02 : f32
    %49 = vector.broadcast %cst_16 : f32 to vector<16x128xf32>
    %50 = arith.maximumf %48, %49 : vector<16x128xf32>
    %51 = arith.mulf %7, %45 : vector<16x128xf32>
    %52 = arith.mulf %9, %50 : vector<16x128xf32>
    %53 = arith.addf %51, %52 : vector<16x128xf32>
    %cst_17 = arith.constant 2.500000e-01 : f32
    %54 = vector.broadcast %cst_17 : f32 to vector<16x128xf32>
    %55 = arith.mulf %54, %53 : vector<16x128xf32>
    %56 = arith.addf %40, %55 : vector<16x128xf32>
    %57 = vector.shape_cast %56 : vector<16x128xf32> to vector<2x8x128xf32>
    %cst_18 = arith.constant dense<0.000000e+00> : vector<8x128xf32>
    %58 = vector.multi_reduction <add>, %57, %cst_18 [0] : vector<2x8x128xf32> to vector<8x128xf32>
    %59 = arith.addf %3, %58 : vector<8x128xf32>
    %c1_i32 = arith.constant 1 : i32
    %c0_19 = arith.constant 0 : index
    %c0_20 = arith.constant 0 : index
    %c0_21 = arith.constant 0 : index
    %60 = vector.load %arg6[%c0_19, %c0_20, %c0_21] : memref<1x8x128xf32, #tpu.memory_space<vmem>>, vector<1x8x128xf32>
    %61 = vector.shape_cast %59 : vector<8x128xf32> to vector<1x8x128xf32>
    %62 = arith.addf %60, %61 : vector<1x8x128xf32>
    %c0_22 = arith.constant 0 : index
    %c0_23 = arith.constant 0 : index
    %c0_24 = arith.constant 0 : index
    %63 = vector.load %arg6[%c0_22, %c0_23, %c0_24] : memref<1x8x128xf32, #tpu.memory_space<vmem>>, vector<1x8x128xf32>
    tpu.vector_store %arg6[%c0_22, %c0_23, %c0_24], %62 {strides = array<i32>} : memref<1x8x128xf32, #tpu.memory_space<vmem>>, vector<1x8x128xf32>,
    return
  }
  func.func @transform_0(%arg0: i32, %arg1: i32) -> (i32, i32) {
    %c1_i32 = arith.constant 1 : i32
    %0 = arith.muli %arg0, %c1_i32 : i32
    %1 = arith.addi %0, %arg1 : i32
    %c0_i32 = arith.constant 0 : i32
    %c0_i32_0 = arith.constant 0 : i32
    return %1, %c0_i32 : i32, i32
  }
  func.func @transform_1(%arg0: i32, %arg1: i32) -> (i32, i32) {
    %c1_i32 = arith.constant 1 : i32
    %0 = arith.muli %arg0, %c1_i32 : i32
    %1 = arith.addi %0, %arg1 : i32
    %c0_i32 = arith.constant 0 : i32
    %c0_i32_0 = arith.constant 0 : i32
    return %1, %c0_i32 : i32, i32
  }
  func.func @transform_2(%arg0: i32, %arg1: i32) -> (i32, i32) {
    %c1_i32 = arith.constant 1 : i32
    %0 = arith.muli %arg0, %c1_i32 : i32
    %1 = arith.addi %0, %arg1 : i32
    %c0_i32 = arith.constant 0 : i32
    %c0_i32_0 = arith.constant 0 : i32
    return %1, %c0_i32 : i32, i32
  }
  func.func @transform_3(%arg0: i32, %arg1: i32) -> (i32, i32) {
    %c1_i32 = arith.constant 1 : i32
    %0 = arith.muli %arg0, %c1_i32 : i32
    %1 = arith.addi %0, %arg1 : i32
    %c0_i32 = arith.constant 0 : i32
    %c0_i32_0 = arith.constant 0 : i32
    return %1, %c0_i32 : i32, i32
  }
  func.func @transform_4(%arg0: i32, %arg1: i32) -> (i32, i32, i32) {
    %c0_i32 = arith.constant 0 : i32
    %c0_i32_0 = arith.constant 0 : i32
    %c0_i32_1 = arith.constant 0 : i32
    return %arg0, %c0_i32, %c0_i32_0 : i32, i32, i32
  }
}

</mosaic_0001>

<bundles_post_ra>
// kernel: tpu_custom_call.1
= control target key start
LH: loop header
LB: loop body
LE: loop exit
PB: predicated region body
PF: predicated region fallthrough
CT: control target
= control target key end

     0   :  { %9 = vsyncpa [#allocation3], 0  ;;  %s570_s0 = inlined_call_operand.hbm [shape: f32[16,128], index: 0, kind: input, shape index: {}]   ;;  %s571_s1 = inlined_call_operand.hbm [shape: f32[16,128], index: 1, kind: input, shape index: {}]   ;;  %s572_s2 = inlined_call_operand.hbm [shape: f32[16,128], index: 2, kind: input, shape index: {}]   ;;  %s573_s3 = inlined_call_operand.hbm [shape: f32[16,128], index: 3, kind: input, shape index: {}]   ;;  %s574_s4 = inlined_call_operand.hbm [shape: f32[1,8,128], index: 4, kind: output, shape index: {}]  }
   0x1   :  { %10 = vsyncpa [#allocation6], 0 }
   0x2   :  { %11 = vsyncpa [#allocation9], 0 }
   0x3   :  { %12 = vsyncpa [#allocation4], 0  ;;  %s394_s15 = smov [#allocation5]   ;;  %s395_s17 = smov [#allocation2]  }
   0x4   :  { %s38_s16 = sshll.u32 %s394_s15, 4  ;;  %s22_s18 = sshll.u32 %s395_s17, 4  ;;  %s39_s16 = int_to_ptr.vmem [resolvable:$true] %s38_s16  ;;  %s426_s18 = int_to_ptr.vmem [resolvable:$true] %s22_s18 }
   0x5   :  { %s276_s21 = scalar_lea.hbm %s571_s1, 256 }
   0x6   :  { %p277_p0 = scmp.ne.s32.totalorder %s571_s1, %s276_s21  ;;  %p280_p1 = scmp.lt.u32.totalorder %s276_s21, %s571_s1 }
   0x8   :  { %p282_p2 = pnand %p280_p1, %p277_p0 }
   0xa   :  { %285 = shalt.err (!%p282_p2)
}
   0xb   :  { %s286_s26 = scalar_lea.vmem %s39_s16, 256  ;;  %p291_p4 = scmp.lt.s32.totalorder %s39_s16, %s39_s16 }
   0xc   :  { %p287_p3 = scmp.ne.s32.totalorder %s39_s16, %s286_s26  ;;  %p292_p5 = scmp.lt.s32.totalorder %s286_s26, %s286_s26 }
   0xe   :  { %p293_p6 = por %p292_p5, %p291_p4 }
  0x10   :  { %p294_p7 = pnand %p293_p6, %p287_p3 }
  0x12   :  { %297 = shalt.err (!%p294_p7)
}
  0x13   :  { %s396_s27 = smov 128   ;;  %s397_s28 = smov 8  }
  0x14   :  { %44 = dma.hbm_to_vmem [thread:$0]  %s571_s1, 256, %s39_s16, [#allocation6], %s396_s27, %s396_s27, %s397_s28  }
  0x15   :  { %s298_s7 = scalar_lea.hbm %s570_s0, 256 }
  0x16   :  { %p299_p8 = scmp.ne.s32.totalorder %s570_s0, %s298_s7  ;;  %p302_p9 = scmp.lt.u32.totalorder %s298_s7, %s570_s0 }
  0x18   :  { %p304_p10 = pnand %p302_p9, %p299_p8 }
  0x1a   :  { %307 = shalt.err (!%p304_p10)
}
  0x1b   :  { %s308_s12 = scalar_lea.vmem %s426_s18, 256  ;;  %p313_p12 = scmp.lt.s32.totalorder %s426_s18, %s426_s18 }
  0x1c   :  { %p309_p11 = scmp.ne.s32.totalorder %s426_s18, %s308_s12  ;;  %p314_p13 = scmp.lt.s32.totalorder %s308_s12, %s308_s12 }
  0x1e   :  { %p315_p0 = por %p314_p13, %p313_p12 }
  0x20   :  { %p316_p1 = pnand %p315_p0, %p309_p11 }
  0x22   :  { %319 = shalt.err (!%p316_p1)
}
  0x23   :  { %28 = dma.hbm_to_vmem [thread:$0]  %s570_s0, 256, %s426_s18, [#allocation3], %s396_s27, %s396_s27, %s397_s28  }
  0x24   :  { %s398_s14 = smov [#allocation7]   ;;  %s399_s16 = smov [#allocation8]  }
  0x25   :  { %s54_s15 = sshll.u32 %s398_s14, 4  ;;  %s70_s17 = sshll.u32 %s399_s16, 4  ;;  %s55_s15 = int_to_ptr.vmem [resolvable:$true] %s54_s15  ;;  %s463_s17 = int_to_ptr.vmem [resolvable:$true] %s70_s17 }
  0x26   :  { %s320_s21 = scalar_lea.hbm %s572_s2, 256 }
  0x27   :  { %p321_p2 = scmp.ne.s32.totalorder %s572_s2, %s320_s21  ;;  %p324_p3 = scmp.lt.u32.totalorder %s320_s21, %s572_s2 }
  0x29   :  { %p326_p4 = pnand %p324_p3, %p321_p2 }
  0x2b   :  { %329 = shalt.err (!%p326_p4)
}
  0x2c   :  { %s330_s0 = scalar_lea.vmem %s55_s15, 256  ;;  %p335_p6 = scmp.lt.s32.totalorder %s55_s15, %s55_s15 }
  0x2d   :  { %p331_p5 = scmp.ne.s32.totalorder %s55_s15, %s330_s0  ;;  %p336_p7 = scmp.lt.s32.totalorder %s330_s0, %s330_s0 }
  0x2f   :  { %p337_p8 = por %p336_p7, %p335_p6 }
  0x31   :  { %p338_p9 = pnand %p337_p8, %p331_p5 }
  0x33   :  { %341 = shalt.err (!%p338_p9)
}
  0x34   :  { %60 = dma.hbm_to_vmem [thread:$0]  %s572_s2, 256, %s55_s15, [#allocation6], %s396_s27, %s396_s27, %s397_s28  }
  0x35   :  { %s342_s5 = scalar_lea.hbm %s573_s3, 256 }
  0x36   :  { %p343_p10 = scmp.ne.s32.totalorder %s573_s3, %s342_s5  ;;  %p346_p11 = scmp.lt.u32.totalorder %s342_s5, %s573_s3 }
  0x38   :  { %p348_p12 = pnand %p346_p11, %p343_p10 }
  0x3a   :  { %351 = shalt.err (!%p348_p12)
}
  0x3b   :  { %s352_s10 = scalar_lea.vmem %s463_s17, 256  ;;  %p357_p0 = scmp.lt.s32.totalorder %s463_s17, %s463_s17 }
  0x3c   :  { %p353_p13 = scmp.ne.s32.totalorder %s463_s17, %s352_s10  ;;  %p358_p1 = scmp.lt.s32.totalorder %s352_s10, %s352_s10 }
  0x3e   :  { %p359_p2 = por %p358_p1, %p357_p0 }
  0x40   :  { %p360_p3 = pnand %p359_p2, %p353_p13 }
  0x42   :  { %363 = shalt.err (!%p360_p3)
}
  0x43   :  { %76 = dma.hbm_to_vmem [thread:$0]  %s573_s3, 256, %s463_s17, [#allocation9], %s396_s27, %s396_s27, %s397_s28  }
  0x44   :  { %386 = dma.done.wait [#allocation3], 256  }
  0x45   :  { %387 = vsyncadd [#allocation3], 4294967040 }
  0x46   :  { %388 = dma.done.wait [#allocation6], 512  }
  0x47   :  { %389 = vsyncadd [#allocation6], 4294966784 }
  0x48   :  { %390 = dma.done.wait [#allocation9], 256  }
  0x49   :  { %391 = vsyncadd [#allocation9], 4294967040  ;;  %v106_v0 = vld [vmem:[#allocation5] sm:$0xff]  ;;  %v107_v1 = vld [vmem:[#allocation5 + $0x8] sm:$0xff]  ;;  %s400_s3 = smov [#allocation10]  }
  0x4a   :  { %252 = vlog2.f32 %v106_v0  ;;  %v114_v2 = vsub.f32 0.0, %v106_v0  ;;  %v142_v3 = vld [vmem:[#allocation7] sm:$0xff]  ;;  %v143_v4 = vld [vmem:[#allocation7 + $0x8] sm:$0xff]  ;;  %v115_v5 = vsub.f32 0.0, %v107_v1  ;;  %v182_v17 = vld [vmem:[#allocation8] sm:$0xff]  ;;  %s233_s27 = sshll.u32 %s400_s3, 4  ;;  %s234_s27 = int_to_ptr.vmem [resolvable:$true] %s233_s27 }
  0x4b   :  { %254 = vlog2.f32 %v107_v1  ;;  %v150_v6 = vsub.f32 0.0, %v142_v3  ;;  %v151_v8 = vsub.f32 0.0, %v143_v4  ;;  %v500_v11 = vld [vmem:[#allocation2] sm:$0xff]  ;;  %v502_v12 = vld [vmem:[#allocation2 + $0x8] sm:$0xff]  ;;  %v183_v18 = vld [vmem:[#allocation8 + $0x8] sm:$0xff]  ;;  %v190_v26 = vsub.f32 0.0, %v182_v17  ;;  %p369_p5 = scmp.lt.s32.totalorder %s234_s27, %s234_s27 }
  0x4c   :  { %v116_v7 = vadd.f32 1.0, %v114_v2  ;;  %256 = vlog2.f32 %v142_v3  ;;  %v119_v9 = vmul.f32 -0.5, %v114_v2  ;;  %v125_v10 = vadd.f32 1.0, %v115_v5  ;;  %s364_s28 = scalar_lea.vmem %s234_s27, 128 }
  0x4d   :  { %258 = vlog2.f32 %v143_v4  ;;  %v122_v13 = vand.u32 2147483647, %v114_v2  ;;  %v152_v14 = vadd.f32 1.0, %v150_v6  ;;  %v128_v15 = vmul.f32 -0.5, %v115_v5  ;;  %p365_p4 = scmp.ne.s32.totalorder %s234_s27, %s364_s28  ;;  %p370_p6 = scmp.lt.s32.totalorder %s364_s28, %s364_s28 }
  0x4e   :  { %260 = vlog2.f32 %v116_v7  ;;  %v131_v16 = vand.u32 2147483647, %v115_v5  ;;  %v155_v19 = vmul.f32 -0.5, %v150_v6  ;;  %v161_v20 = vadd.f32 1.0, %v151_v8 }
  0x4f   :  { %262 = vlog2.f32 %v125_v10  ;;  %v505_v21 = vsub.f32 1.0, %v500_v11  ;;  %v508_v22 = vsub.f32 1.0, %v502_v12  ;;  %v120_v23 = vadd.f32 1.0, %v119_v9  ;;  %p371_p7 = por %p370_p6, %p369_p5 }
  0x50   :  { %264 = vlog2.f32 %v152_v14  ;;  %v164_v24 = vmul.f32 -0.5, %v151_v8  ;;  %vm510_vm0 = vcmp.lt.f32.partialorder %v122_v13, 0.0004427343  ;;  %v514_v27 = vsub.f32 0.0, %v183_v18 }
  0x51   :  { %266 = vlog2.f32 %v161_v20  ;;  %v129_v28 = vadd.f32 1.0, %v128_v15  ;;  %vm516_vm1 = vcmp.lt.f32.partialorder %v131_v16, 0.0004427343  ;;  %v158_v30 = vand.u32 2147483647, %v150_v6  ;;  %p372_p8 = pnand %p371_p7, %p365_p4 }
  0x52   :  { %268 = vlog2.f32 %v182_v17  ;;  %v156_v32 = vadd.f32 1.0, %v155_v19  ;;  %v192_v33 = vadd.f32 1.0, %v190_v26  ;;  %v195_v34 = vmul.f32 -0.5, %v190_v26 }
  0x53   :  { %270 = vlog2.f32 %v183_v18  ;;  %v165_v37 = vadd.f32 1.0, %v164_v24  ;;  %v167_v38 = vand.u32 2147483647, %v151_v8  ;;  %v201_v39 = vadd.f32 1.0, %v514_v27 }
  0x54   :  { %v253_v31 = vpop.eup %252  ;;  %v121_v41 = vmul.f32 %v120_v23, %v114_v2  ;;  %272 = vlog2.f32 %v192_v33  ;;  %v198_v42 = vand.u32 2147483647, %v190_v26  ;;  %v204_v43 = vmul.f32 -0.5, %v514_v27 }
  0x55   :  { %v255_v35 = vpop.eup %254  ;;  %v109_v36 = vmul.f32 0.6931472, %v253_v31  ;;  %v196_v47 = vadd.f32 1.0, %v195_v34  ;;  %274 = vlog2.f32 %v201_v39  ;;  %v130_v49 = vmul.f32 %v129_v28, %v115_v5 }
  0x56   :  { %v257_v40 = vpop.eup %256  ;;  %v111_v45 = vmul.f32 0.6931472, %v255_v35  ;;  %v157_v51 = vmul.f32 %v156_v32, %v150_v6  ;;  %vm522_vm2 = vcmp.lt.f32.partialorder %v158_v30, 0.0004427343  ;;  %v166_v56 = vmul.f32 %v165_v37, %v151_v8 }
  0x57   :  { %v259_v44 = vpop.eup %258  ;;  %v145_v46 = vmul.f32 0.6931472, %v257_v40  ;;  %v112_v54 = vmax.f32 %v109_v36, -100.0  ;;  %vm526_vm3 = vcmp.lt.f32.partialorder %v167_v38, 0.0004427343  ;;  %v205_v62 = vadd.f32 1.0, %v204_v43 }
  0x58   :  { %v261_v48 = vpop.eup %260  ;;  %v147_v50 = vmul.f32 0.6931472, %v259_v44  ;;  %vm530_vm4 = vcmp.lt.f32.partialorder %v198_v42, 0.0004427343  ;;  %v113_v63 = vmax.f32 %v111_v45, -100.0  ;;  %v197_v2 = vmul.f32 %v196_v47, %v190_v26 }
  0x59   :  { %v263_v53 = vpop.eup %262  ;;  %v118_v55 = vmul.f32 0.6931472, %v261_v48  ;;  %v148_v60 = vmax.f32 %v145_v46, -100.0  ;;  %v207_v7 = vand.u32 2147483647, %v514_v27  ;;  %v136_v10 = vmul.f32 %v112_v54, %v500_v11 }
  0x5a   :  { %v265_v58 = vpop.eup %264  ;;  %v127_v59 = vmul.f32 0.6931472, %v263_v53  ;;  %v149_v6 = vmax.f32 %v147_v50, -100.0  ;;  %v206_v19 = vmul.f32 %v205_v62, %v514_v27  ;;  %v137_v20 = vmul.f32 %v113_v63, %v502_v12 }
  0x5b   :  { %v124_v0 = vsel %vm510_vm0, %v121_v41, %v118_v55  ;;  %v154_v1 = vmul.f32 0.6931472, %v265_v58  ;;  %v267_v3 = vpop.eup %266  ;;  %v172_v17 = vmul.f32 %v148_v60, %v500_v11  ;;  %vm208_vm5 = vcmp.lt.f32.partialorder %v207_v7, 0.0004427343 }
  0x5c   :  { %v133_v4 = vsel %vm516_vm1, %v130_v49, %v127_v59  ;;  %v134_v5 = vmax.f32 %v124_v0, -100.0  ;;  %v269_v8 = vpop.eup %268  ;;  %v163_v14 = vmul.f32 0.6931472, %v267_v3  ;;  %v173_v29 = vmul.f32 %v149_v6, %v502_v12 }
  0x5d   :  { %v135_v9 = vmax.f32 %v133_v4, -100.0  ;;  %v160_v13 = vsel %vm522_vm2, %v157_v51, %v154_v1  ;;  %v271_v15 = vpop.eup %270  ;;  %v185_v18 = vmul.f32 0.6931472, %v269_v8 }
  0x5e   :  { %v170_v16 = vmax.f32 %v160_v13, -100.0  ;;  %v138_v23 = vmul.f32 %v134_v5, %v505_v21  ;;  %v169_v24 = vsel %vm526_vm3, %v166_v56, %v163_v14  ;;  %v187_v25 = vmul.f32 0.6931472, %v271_v15  ;;  %v273_v26 = vpop.eup %272 }
  0x5f   :  { %v171_v28 = vmax.f32 %v169_v24, -100.0  ;;  %v188_v31 = vmax.f32 %v185_v18, -100.0  ;;  %v275_v32 = vpop.eup %274  ;;  %v139_v33 = vmul.f32 %v135_v9, %v508_v22  ;;  %v194_v27 = vmul.f32 0.6931472, %v273_v26 }
  0x60   :  { %v174_v30 = vmul.f32 %v170_v16, %v505_v21  ;;  %v189_v34 = vmax.f32 %v187_v25, -100.0  ;;  %v203_v37 = vmul.f32 0.6931472, %v275_v32  ;;  %v140_v38 = vadd.f32 %v138_v23, %v136_v10 }
  0x61   :  { %v175_v35 = vmul.f32 %v171_v28, %v508_v22  ;;  %v200_v39 = vsel %vm530_vm4, %v197_v2, %v194_v27  ;;  %v212_v40 = vmul.f32 %v188_v31, %v500_v11  ;;  %v141_v45 = vadd.f32 %v139_v33, %v137_v20 }
  0x62   :  { %v176_v36 = vadd.f32 %v174_v30, %v172_v17  ;;  %v209_v43 = vsel %vm208_vm5, %v206_v19, %v203_v37  ;;  %v210_v44 = vmax.f32 %v200_v39, -100.0  ;;  %v213_v47 = vmul.f32 %v189_v34, %v502_v12 }
  0x63   :  { %v177_v41 = vadd.f32 %v175_v35, %v173_v29  ;;  %v211_v46 = vmax.f32 %v209_v43, -100.0 }
  0x64   :  { %v178_v42 = vmul.f32 0.5, %v176_v36  ;;  %v214_v49 = vmul.f32 %v210_v44, %v505_v21 }
  0x65   :  { %v179_v48 = vmul.f32 0.5, %v177_v41  ;;  %v215_v50 = vmul.f32 %v211_v46, %v508_v22 }
  0x66   :  { %v180_v51 = vadd.f32 %v178_v42, %v140_v38  ;;  %v216_v52 = vadd.f32 %v214_v49, %v212_v40 }
  0x67   :  { %v181_v53 = vadd.f32 %v179_v48, %v141_v45  ;;  %v217_v54 = vadd.f32 %v215_v50, %v213_v47 }
  0x68   :  { %v218_v55 = vmul.f32 0.25, %v216_v52 }
  0x69   :  { %v219_v56 = vmul.f32 0.25, %v217_v54 }
  0x6a   :  { %v220_v11 = vadd.f32 %v218_v55, %v180_v51 }
  0x6b   :  { %v221_v57 = vadd.f32 %v219_v56, %v181_v53 }
  0x6d   :  { %v222_v58 = vadd.f32 %v221_v57, %v220_v11 }
  0x6f   :  { %226 = vst [vmem:[#allocation10] sm:$0xff] %v222_v58 }
  0x70   :  { %375 = shalt.err (!%p372_p8)
}
  0x71   :  { %s376_s13 = scalar_lea.hbm %s574_s4, 128 }
  0x72   :  { %p377_p9 = scmp.ne.s32.totalorder %s574_s4, %s376_s13  ;;  %p380_p10 = scmp.lt.u32.totalorder %s376_s13, %s574_s4 }
  0x74   :  { %p382_p11 = pnand %p380_p10, %p377_p9 }
  0x76   :  { %385 = shalt.err (!%p382_p11)
}
  0x77   :  { %236 = dma.vmem_to_hbm [thread:$0]  %s234_s27, 128, %s574_s4, [#allocation4]  }
  0x78   :  { %392 = dma.done.wait [#allocation4], 128  }
  0x79   :  { %393 = vsyncadd [#allocation4], 4294967168 }
  0x7a   :  { %240 = vsyncpa [#allocation3], 1 }
  0x7b   :  { %241 = vsyncpa [#allocation6], 1 }
  0x7c   :  { %242 = vsyncpa [#allocation9], 1 }
  0x7d   :  { %243 = vsyncpa [#allocation4], 1 }

</bundles_post_ra>
